<compile_context>
chip_gen: v5e
topology: v5e:2x2
jax: 0.10.0
libtpu: 0.0.40
codegen_flags: <defaults>
</compile_context>

<pallas_src>
import numpy as np

import jax
import jax.numpy as jnp
from jax.experimental import pallas as pl
from jax.experimental.pallas import tpu as pltpu


def _round_up(x: int, m: int) -> int:
    return ((x + m - 1) // m) * m


def _make_kernel(bin_area: float, num_types: int, out_dtype):
    def kernel(a_ref, oh_ref, b_ref, out_ref):
        # a_ref  : (T, TM, K1)  bf16  x-overlap weights (streamed per row tile)
        # oh_ref : (T, K1, K2)  bf16  per-type one-hot site masks (resident, built once)
        # b_ref  : (T, K2, N)   f32   y-overlap weights, pre-transposed (resident)
        # out_ref: (T, TM, N)   out_dtype fixed-demand slab
        for t in range(num_types):   # static, unrolled loop over the 3 site types
            # big matmul: bf16 x bf16 -> f32 (single-pass MXU; one-hot is exact 0/1)
            tmp = jnp.dot(a_ref[t], oh_ref[t],
                          preferred_element_type=jnp.float32)        # (TM, K2) f32
            # small matmul kept in f32 for accuracy of bin_area - cap
            cap = jnp.dot(tmp, b_ref[t],
                          preferred_element_type=jnp.float32)        # (TM, N)  f32
            out_ref[t] = (jnp.float32(bin_area) - cap).astype(out_dtype)

    return kernel


def _overlap_weights(nb, bin_sz, n_sites, sizes):
    # W[t, b, s] = |[b*bin_sz, (b+1)*bin_sz) ∩ [s, s + sizes[t])|   (f32)
    lo = jnp.arange(nb, dtype=jnp.float32)[None, :, None] * bin_sz   # (1, nb, 1)
    hi = lo + bin_sz
    s0 = jnp.arange(n_sites, dtype=jnp.float32)[None, None, :]       # (1, 1, ns)
    s1 = s0 + sizes.astype(jnp.float32)[:, None, None]               # (T, 1, ns)
    return jnp.maximum(jnp.minimum(hi, s1) - jnp.maximum(lo, s0), 0.0)


def _vmem_capacity_bytes() -> int:
    try:
        info = pltpu.get_tpu_info()
        cap = getattr(info, "vmem_capacity_bytes", None)
        if cap:
            return int(cap)
    except Exception:
        pass
    return 64 * 1024 * 1024   # conservative default (v7x per-TensorCore VMEM)


def demand_map_forward(site_type_map, node_size_x, node_size_y,
                       num_bins_x, num_bins_y, width, height,
                       xh, xl, yh, yl):
    """Returns [fixedDemMap0, fixedDemMap1, fixedDemMap2, fixedDemMap3],
    each of shape (num_bins_x, num_bins_y), dtype = node_size_x.dtype."""
    dtype = node_size_x.dtype
    W, H = site_type_map.shape
    assert (W, H) == (width, height)

    binW = float(width) / float(num_bins_x)
    binH = float(height) / float(num_bins_y)
    bin_area = float((xh - xl) / num_bins_x) * float((yh - yl) / num_bins_y)

    sx = node_size_x[1:4]   # footprint sizes for site types 1, 2, 3
    sy = node_size_y[1:4]

    # Pick the cheaper matmul association (static shapes -> Python if):
    #   order A: (Wx @ S) @ WyT     order B: realized by swapping x/y roles
    flops_a = num_bins_x * W * H + num_bins_x * H * num_bins_y
    flops_b = W * H * num_bins_y + num_bins_x * W * num_bins_y
    swap_xy = flops_b < flops_a

    if not swap_xy:
        M_out, K1, K2, N_out = num_bins_x, W, H, num_bins_y
        stm = site_type_map
        A = _overlap_weights(num_bins_x, binW, W, sx)                       # (3,NBX,W)
        B = jnp.swapaxes(_overlap_weights(num_bins_y, binH, H, sy), 1, 2)   # (3,H,NBY)
    else:
        M_out, K1, K2, N_out = num_bins_y, H, W, num_bins_x
        stm = jnp.swapaxes(site_type_map, 0, 1)
        A = _overlap_weights(num_bins_y, binH, H, sy)                       # (3,NBY,H)
        B = jnp.swapaxes(_overlap_weights(num_bins_x, binW, W, sx), 1, 2)   # (3,W,NBX)

    # TPU alignment: lane dims -> multiple of 128, sublane dims -> multiple of 8.
    K1_pad = _round_up(K1, 128)
    K2_pad = _round_up(K2, 128)
    N_pad = _round_up(N_out, 128)

    # Kernel-side output dtype: emit directly in the model dtype when it is a
    # <=32-bit float (halves writeback for bf16 models), else fall back to f32.
    if jnp.issubdtype(dtype, jnp.floating) and jnp.dtype(dtype).itemsize <= 4:
        out_kdtype = jnp.dtype(dtype)
    else:
        out_kdtype = jnp.dtype(jnp.float32)
    out_isz = out_kdtype.itemsize

    # ---- Generation-aware tile size / VMEM budget ---------------------------
    oh_bytes = 3 * K1_pad * K2_pad * 2        # bf16 one-hots, single-buffered, resident
    b_bytes = 3 * K2_pad * N_pad * 4          # f32 y-weights, single-buffered, resident

    def footprint(tm):
        a = 2 * 3 * tm * K1_pad * 2                       # streamed A (double-buffered)
        o = 2 * 3 * tm * N_pad * out_isz                  # streamed out (double-buffered)
        scratch = 3 * tm * K2_pad * 4 + 2 * tm * N_pad * 4  # in-kernel temporaries (conservative)
        return a + o + oh_bytes + b_bytes + scratch

    vmem_cap = _vmem_capacity_bytes()
    budget = int(vmem_cap * 0.80)             # leave headroom for Mosaic internal scratch

    # >=2 grid points whenever possible so both v7x TensorCores get work; cap TM
    # at 512 (multiple of the 256-wide MXU); shrink to fit the VMEM budget.
    if M_out >= 16:
        TM = min(512, _round_up((M_out + 1) // 2, 8))
    else:
        TM = _round_up(max(M_out, 1), 8)
    while footprint(TM) > budget and TM > 8:
        TM = max(8, _round_up(TM // 2, 8))
    # TODO(synk): if the resident one-hot/B slabs alone exceed VMEM (pathologically
    # large site maps), a K-tiled accumulation grid would be needed.

    M_pad = _round_up(M_out, TM)
    num_tiles = M_pad // TM
    vmem_limit = int(min(vmem_cap,
                         max(32 * 1024 * 1024, footprint(TM) + 8 * 1024 * 1024)))

    # ---- Operand preparation (padding = type 0 / zero weights -> contributes 0)
    A = jnp.pad(A.astype(jnp.bfloat16),
                ((0, 0), (0, M_pad - M_out), (0, K1_pad - K1)))
    B = jnp.pad(B.astype(jnp.float32),
                ((0, 0), (0, K2_pad - K2), (0, N_pad - N_out)))
    stm_p = jnp.pad(stm.astype(jnp.int32), ((0, K1_pad - K1), (0, K2_pad - K2)))
    # Per-type one-hot built ONCE here (cheap XLA compare); inside the kernel it is
    # a constant-index, single-buffered resident slab -> never rebuilt per tile.
    onehot = (stm_p[None, :, :] ==
              jnp.arange(1, 4, dtype=jnp.int32)[:, None, None]).astype(jnp.bfloat16)

    fixed = pl.pallas_call(
        _make_kernel(bin_area, 3, out_kdtype),
        out_shape=jax.ShapeDtypeStruct((3, M_pad, N_pad), out_kdtype),
        grid_spec=pltpu.PrefetchScalarGridSpec(
            num_scalar_prefetch=0,
            grid=(num_tiles,),   # tiles of output rows; all 3 types per step
            in_specs=[
                pl.BlockSpec((3, TM, K1_pad), lambda i: (0, i, 0)),
                pl.BlockSpec((3, K1_pad, K2_pad), lambda i: (0, 0, 0),
                             pipeline_mode=pl.Buffered(1)),   # constant -> single buffer
                pl.BlockSpec((3, K2_pad, N_pad), lambda i: (0, 0, 0),
                             pipeline_mode=pl.Buffered(1)),   # constant -> single buffer
            ],
            out_specs=pl.BlockSpec((3, TM, N_pad), lambda i: (0, i, 0)),
        ),
        compiler_params=pltpu.CompilerParams(
            dimension_semantics=("parallel",),
            vmem_limit_bytes=vmem_limit,
        ),
    )(A, onehot, B)

    fixed = fixed[:, :M_out, :N_out]
    if swap_xy:
        fixed = jnp.swapaxes(fixed, 1, 2)   # back to (3, NBX, NBY)
    fixed = fixed.astype(dtype)

    fixedDemMap0 = fixed[0]
    fixedDemMap1 = fixed[0]   # binCapMap1 = binCapMap0 in the reference
    fixedDemMap2 = fixed[1]
    fixedDemMap3 = fixed[2]
    return [fixedDemMap0, fixedDemMap1, fixedDemMap2, fixedDemMap3]


def _numpy_reference(site_type_map, nsx, nsy, nbx, nby, width, height,
                     xh, xl, yh, yl):
    """Direct scatter reference mirroring the C++ per-site loop (f64)."""
    binW = width / nbx
    binH = height / nby
    caps = {t: np.zeros((nbx, nby), np.float64) for t in (1, 2, 3)}
    for ix in range(width):
        for iy in range(height):
            t = int(site_type_map[ix, iy])
            if t not in (1, 2, 3):
                continue
            sxv = float(nsx[t])
            syv = float(nsy[t])
            iLo, jLo = int(ix / binW), int(iy / binH)
            iHi = min(int((ix + sxv) / binW), nbx - 1)
            jHi = min(int((iy + syv) / binH), nby - 1)
            for i in range(iLo, iHi + 1):
                w = min((i + 1) * binW, ix + sxv) - max(i * binW, ix)
                for j in range(jLo, jHi + 1):
                    h = min((j + 1) * binH, iy + syv) - max(j * binH, iy)
                    caps[t][i, j] += w * h
    bin_area = ((xh - xl) / nbx) * ((yh - yl) / nby)
    fd0 = bin_area - caps[1]
    return [fd0, fd0.copy(), bin_area - caps[2], bin_area - caps[3]]


if __name__ == "__main__":
    key = jax.random.PRNGKey(0)

    width, height = 32, 32           # site grid
    num_bins_x, num_bins_y = 16, 16  # bin grid
    xl, xh = 0.0, float(width)
    yl, yh = 0.0, float(height)

    # Site types: 0 = empty, 1 = SLICE, 2 = DSP, 3 = RAM
    site_type_map = jax.random.randint(key, (width, height), 0, 4,
                                       dtype=jnp.int32)
    # Per-type footprints (FPGA-like: DSP / RAM sites are taller).
    node_size_x = jnp.asarray([0.0, 1.0, 1.0, 1.0], dtype=jnp.float32)
    node_size_y = jnp.asarray([0.0, 1.0, 2.5, 5.0], dtype=jnp.float32)

    outs = demand_map_forward(site_type_map, node_size_x, node_size_y,
                              num_bins_x, num_bins_y, width, height,
                              xh, xl, yh, yl)
    outs = [jax.block_until_ready(o) for o in outs]

    refs = _numpy_reference(np.asarray(site_type_map),
                            np.asarray(node_size_x), np.asarray(node_size_y),
                            num_bins_x, num_bins_y, width, height,
                            xh, xl, yh, yl)
    for got, want in zip(outs, refs):
        np.testing.assert_allclose(np.asarray(got), want, rtol=1e-3, atol=1e-3)

    print("KERNEL_OK")
</pallas_src>

<mosaic_0001>
module attributes {stable_mosaic.version = 11 : i64} {
  func.func @kernel(%arg0: i32, %arg1: memref<3x8x128xbf16, #tpu.memory_space<vmem>>, %arg2: memref<3x128x128xbf16, #tpu.memory_space<vmem>>, %arg3: memref<3x128x128xf32, #tpu.memory_space<vmem>>, %arg4: memref<3x8x128xf32, #tpu.memory_space<vmem>>) attributes {dimension_semantics = [#tpu.dimension_semantics<parallel>], iteration_bounds = array<i64: 2>, scalar_prefetch = 0 : i64, scratch_operands = 0 : i64, tpu.core_type = #tpu.core_type<tc>, window_params = [{transform_indices = @transform_0, window_bounds = array<i64: 3, 8, 128>}, {pipeline_mode = #tpu.pipeline_mode<synchronous>, transform_indices = @transform_1, window_bounds = array<i64: 3, 128, 128>}, {pipeline_mode = #tpu.pipeline_mode<synchronous>, transform_indices = @transform_2, window_bounds = array<i64: 3, 128, 128>}, {transform_indices = @transform_3, window_bounds = array<i64: 3, 8, 128>}]} {
    %c0 = arith.constant 0 : index
    %c0_0 = arith.constant 0 : index
    %c0_1 = arith.constant 0 : index
    %0 = vector.load %arg1[%c0, %c0_0, %c0_1] : memref<3x8x128xbf16, #tpu.memory_space<vmem>>, vector<1x8x128xbf16>
    %1 = vector.shape_cast %0 : vector<1x8x128xbf16> to vector<8x128xbf16>
    %c0_2 = arith.constant 0 : index
    %c0_3 = arith.constant 0 : index
    %c0_4 = arith.constant 0 : index
    %2 = vector.load %arg2[%c0_2, %c0_3, %c0_4] : memref<3x128x128xbf16, #tpu.memory_space<vmem>>, vector<1x128x128xbf16>
    %3 = vector.shape_cast %2 : vector<1x128x128xbf16> to vector<128x128xbf16>
    %cst = arith.constant dense<0.000000e+00> : vector<8x128xf32>
    %4 = tpu.matmul %1, %3, %cst {dimension_numbers = #tpu.dot_dimension_numbers<[1], [0], [0], [1], [0, 0, 1, 1], [], []>} : vector<8x128xbf16>, vector<128x128xbf16>, vector<8x128xf32> -> vector<8x128xf32>
    %c0_5 = arith.constant 0 : index
    %c0_6 = arith.constant 0 : index
    %c0_7 = arith.constant 0 : index
    %5 = vector.load %arg3[%c0_5, %c0_6, %c0_7] : memref<3x128x128xf32, #tpu.memory_space<vmem>>, vector<1x128x128xf32>
    %6 = vector.shape_cast %5 : vector<1x128x128xf32> to vector<128x128xf32>
    %cst_8 = arith.constant dense<0.000000e+00> : vector<8x128xf32>
    %7 = tpu.matmul %4, %6, %cst_8 {dimension_numbers = #tpu.dot_dimension_numbers<[1], [0], [0], [1], [0, 0, 1, 1], [], []>} : vector<8x128xf32>, vector<128x128xf32>, vector<8x128xf32> -> vector<8x128xf32>
    %cst_9 = arith.constant 4.000000e+00 : f32
    %8 = vector.broadcast %cst_9 : f32 to vector<8x128xf32>
    %9 = arith.subf %8, %7 : vector<8x128xf32>
    %c0_10 = arith.constant 0 : index
    %c0_11 = arith.constant 0 : index
    %c0_12 = arith.constant 0 : index
    %10 = vector.load %arg4[%c0_10, %c0_11, %c0_12] : memref<3x8x128xf32, #tpu.memory_space<vmem>>, vector<1x8x128xf32>
    %11 = vector.shape_cast %10 : vector<1x8x128xf32> to vector<8x128xf32>
    %12 = vector.shape_cast %9 : vector<8x128xf32> to vector<1x8x128xf32>
    tpu.vector_store %arg4[%c0_10, %c0_11, %c0_12], %12 {strides = array<i32>} : memref<3x8x128xf32, #tpu.memory_space<vmem>>, vector<1x8x128xf32>,
    %c1 = arith.constant 1 : index
    %c0_13 = arith.constant 0 : index
    %c0_14 = arith.constant 0 : index
    %13 = vector.load %arg1[%c1, %c0_13, %c0_14] : memref<3x8x128xbf16, #tpu.memory_space<vmem>>, vector<1x8x128xbf16>
    %14 = vector.shape_cast %13 : vector<1x8x128xbf16> to vector<8x128xbf16>
    %c1_15 = arith.constant 1 : index
    %c0_16 = arith.constant 0 : index
    %c0_17 = arith.constant 0 : index
    %15 = vector.load %arg2[%c1_15, %c0_16, %c0_17] : memref<3x128x128xbf16, #tpu.memory_space<vmem>>, vector<1x128x128xbf16>
    %16 = vector.shape_cast %15 : vector<1x128x128xbf16> to vector<128x128xbf16>
    %cst_18 = arith.constant dense<0.000000e+00> : vector<8x128xf32>
    %17 = tpu.matmul %14, %16, %cst_18 {dimension_numbers = #tpu.dot_dimension_numbers<[1], [0], [0], [1], [0, 0, 1, 1], [], []>} : vector<8x128xbf16>, vector<128x128xbf16>, vector<8x128xf32> -> vector<8x128xf32>
    %c1_19 = arith.constant 1 : index
    %c0_20 = arith.constant 0 : index
    %c0_21 = arith.constant 0 : index
    %18 = vector.load %arg3[%c1_19, %c0_20, %c0_21] : memref<3x128x128xf32, #tpu.memory_space<vmem>>, vector<1x128x128xf32>
    %19 = vector.shape_cast %18 : vector<1x128x128xf32> to vector<128x128xf32>
    %cst_22 = arith.constant dense<0.000000e+00> : vector<8x128xf32>
    %20 = tpu.matmul %17, %19, %cst_22 {dimension_numbers = #tpu.dot_dimension_numbers<[1], [0], [0], [1], [0, 0, 1, 1], [], []>} : vector<8x128xf32>, vector<128x128xf32>, vector<8x128xf32> -> vector<8x128xf32>
    %cst_23 = arith.constant 4.000000e+00 : f32
    %21 = vector.broadcast %cst_23 : f32 to vector<8x128xf32>
    %22 = arith.subf %21, %20 : vector<8x128xf32>
    %c1_24 = arith.constant 1 : index
    %c0_25 = arith.constant 0 : index
    %c0_26 = arith.constant 0 : index
    %23 = vector.load %arg4[%c1_24, %c0_25, %c0_26] : memref<3x8x128xf32, #tpu.memory_space<vmem>>, vector<1x8x128xf32>
    %24 = vector.shape_cast %23 : vector<1x8x128xf32> to vector<8x128xf32>
    %25 = vector.shape_cast %22 : vector<8x128xf32> to vector<1x8x128xf32>
    tpu.vector_store %arg4[%c1_24, %c0_25, %c0_26], %25 {strides = array<i32>} : memref<3x8x128xf32, #tpu.memory_space<vmem>>, vector<1x8x128xf32>,
    %c2 = arith.constant 2 : index
    %c0_27 = arith.constant 0 : index
    %c0_28 = arith.constant 0 : index
    %26 = vector.load %arg1[%c2, %c0_27, %c0_28] : memref<3x8x128xbf16, #tpu.memory_space<vmem>>, vector<1x8x128xbf16>
    %27 = vector.shape_cast %26 : vector<1x8x128xbf16> to vector<8x128xbf16>
    %c2_29 = arith.constant 2 : index
    %c0_30 = arith.constant 0 : index
    %c0_31 = arith.constant 0 : index
    %28 = vector.load %arg2[%c2_29, %c0_30, %c0_31] : memref<3x128x128xbf16, #tpu.memory_space<vmem>>, vector<1x128x128xbf16>
    %29 = vector.shape_cast %28 : vector<1x128x128xbf16> to vector<128x128xbf16>
    %cst_32 = arith.constant dense<0.000000e+00> : vector<8x128xf32>
    %30 = tpu.matmul %27, %29, %cst_32 {dimension_numbers = #tpu.dot_dimension_numbers<[1], [0], [0], [1], [0, 0, 1, 1], [], []>} : vector<8x128xbf16>, vector<128x128xbf16>, vector<8x128xf32> -> vector<8x128xf32>
    %c2_33 = arith.constant 2 : index
    %c0_34 = arith.constant 0 : index
    %c0_35 = arith.constant 0 : index
    %31 = vector.load %arg3[%c2_33, %c0_34, %c0_35] : memref<3x128x128xf32, #tpu.memory_space<vmem>>, vector<1x128x128xf32>
    %32 = vector.shape_cast %31 : vector<1x128x128xf32> to vector<128x128xf32>
    %cst_36 = arith.constant dense<0.000000e+00> : vector<8x128xf32>
    %33 = tpu.matmul %30, %32, %cst_36 {dimension_numbers = #tpu.dot_dimension_numbers<[1], [0], [0], [1], [0, 0, 1, 1], [], []>} : vector<8x128xf32>, vector<128x128xf32>, vector<8x128xf32> -> vector<8x128xf32>
    %cst_37 = arith.constant 4.000000e+00 : f32
    %34 = vector.broadcast %cst_37 : f32 to vector<8x128xf32>
    %35 = arith.subf %34, %33 : vector<8x128xf32>
    %c2_38 = arith.constant 2 : index
    %c0_39 = arith.constant 0 : index
    %c0_40 = arith.constant 0 : index
    %36 = vector.load %arg4[%c2_38, %c0_39, %c0_40] : memref<3x8x128xf32, #tpu.memory_space<vmem>>, vector<1x8x128xf32>
    %37 = vector.shape_cast %36 : vector<1x8x128xf32> to vector<8x128xf32>
    %38 = vector.shape_cast %35 : vector<8x128xf32> to vector<1x8x128xf32>
    tpu.vector_store %arg4[%c2_38, %c0_39, %c0_40], %38 {strides = array<i32>} : memref<3x8x128xf32, #tpu.memory_space<vmem>>, vector<1x8x128xf32>,
    return
  }
  func.func @transform_0(%arg0: i32) -> (i32, i32, i32) {
    %c0_i32 = arith.constant 0 : i32
    %c0_i32_0 = arith.constant 0 : i32
    %c0_i32_1 = arith.constant 0 : i32
    return %c0_i32, %arg0, %c0_i32_0 : i32, i32, i32
  }
  func.func @transform_1(%arg0: i32) -> (i32, i32, i32) {
    %c0_i32 = arith.constant 0 : i32
    %c0_i32_0 = arith.constant 0 : i32
    %c0_i32_1 = arith.constant 0 : i32
    %c0_i32_2 = arith.constant 0 : i32
    return %c0_i32, %c0_i32_0, %c0_i32_1 : i32, i32, i32
  }
  func.func @transform_2(%arg0: i32) -> (i32, i32, i32) {
    %c0_i32 = arith.constant 0 : i32
    %c0_i32_0 = arith.constant 0 : i32
    %c0_i32_1 = arith.constant 0 : i32
    %c0_i32_2 = arith.constant 0 : i32
    return %c0_i32, %c0_i32_0, %c0_i32_1 : i32, i32, i32
  }
  func.func @transform_3(%arg0: i32) -> (i32, i32, i32) {
    %c0_i32 = arith.constant 0 : i32
    %c0_i32_0 = arith.constant 0 : i32
    %c0_i32_1 = arith.constant 0 : i32
    return %c0_i32, %arg0, %c0_i32_0 : i32, i32, i32
  }
}

</mosaic_0001>

<bundles_post_ra>
// kernel: tpu_custom_call.1
= control target key start
LH: loop header
LB: loop body
LE: loop exit
PB: predicated region body
PF: predicated region fallthrough
CT: control target
= control target key end

     0   :  { %8 = vsyncpa [#allocation3], 0  ;;  %s1245_s0 = inlined_call_operand.hbm [shape: bf16[3,16,128], index: 0, kind: input, shape index: {}]   ;;  %s1246_s1 = inlined_call_operand.hbm [shape: bf16[3,128,128], index: 1, kind: input, shape index: {}]   ;;  %s1247_s2 = inlined_call_operand.hbm [shape: f32[3,128,128], index: 2, kind: input, shape index: {}]   ;;  %s1248_s3 = inlined_call_operand.hbm [shape: f32[3,16,128], index: 3, kind: output, shape index: {}]  }
   0x1   :  { %10 = vsyncpa [#allocation3 + $0x1], 0 }
   0x2   :  { %11 = vsyncpa [#allocation6], 0 }
   0x3   :  { %12 = vsyncpa [#allocation4], 0 }
   0x4   :  { %14 = vsyncpa [#allocation4 + $0x1], 0  ;;  %s1090_s12 = smov 0   ;;  %s1092_s13 = smov 0  }
   0x5   :  { %s1094_s14 = smov 0   ;;  %s1096_s15 = smov 0  }
   0x6 LB: > { %s1111_s16 = sadd.s32 4294967295, %s1059_s15   ;;  %s686_s17 = sadd.s32 4294967294, %s1059_s15   ;;  %s1059_s15 = sphi %s1096_s15, %s1262_s15   ;;  %s1055_s14 = sphi %s1094_s14, %s1261_s14   ;;  %s1051_s13 = sphi %s1092_s13, %s1260_s13   ;;  %s1047_s12 = sphi %s1090_s12, %s1259_s12  }
   0x7   : > { %p40_p0 = scmp.ne.s32.totalorder %s1051_s13, %s1047_s12  ;;  %p41_p1 = scmp.eq.s32.totalorder %s1111_s16, 0 }
   0x8   : > { %p106_p2 = scmp.eq.s32.totalorder %s1111_s16, 1  ;;  %p112_p3 = scmp.eq.s32.totalorder %s686_s17, 1 }
   0x9   : > { %p1120_p4 = por %p41_p1, %p40_p0  ;;  %p687_p5 = scmp.ge.s32.totalorder %s1059_s15, 1 }
   0xa   : > { %p1125_p6 = por %p112_p3, %p40_p0  ;;  %p119_p7 = scmp.lt.s32.totalorder %s1059_s15, 3 }
   0xb   : > { %s130_s22 = sshll.u32 %s1246_s1, 4  ;;  %s1061_s24 = smov [#allocation5]   ;;  %s131_s22 = int_to_ptr.hbm [resolvable:$true] %s130_s22 }
   0xc   : > { %p1133_p8 = pnand %p687_p5, %p119_p7  ;;  %s132_s25 = sshll.u32 %s1061_s24, 4  ;;  %s133_s25 = int_to_ptr.vmem [resolvable:$true] %s132_s25 }
   0xd   : > { %s144_s28 = sshll.u32 %s1247_s2, 4  ;;  %s1250_s29 = smov 64   ;;  %s145_s28 = int_to_ptr.hbm [resolvable:$true] %s144_s28 }
   0xe   : > { %p837_p9 = pneg %p1133_p8  ;;  %s1063_s30 = smov 4  }
   0xf   : > { %s1064_s4 = smov [#allocation7]   ;;  %s1249_s6 = smov 128  }
  0x10   : > { %p838_p10 = pnand %p837_p9, %p41_p1  ;;  %s146_s5 = sshll.u32 %s1064_s4, 4  ;;  %s147_s5 = int_to_ptr.vmem [resolvable:$true] %s146_s5 }
  0x11   : > { %s1066_s7 = smov 8   ;;  %s1151_s8 = sadd.s32 1, %s1059_s15  }
  0x12   : > { %840 = dma.hbm_to_vmem [thread:$0]  (!%p838_p10), %s131_s22, 3072, %s133_s25, [#allocation6], %s1250_s29, %s1250_s29, %s1063_s30  }
  0x13   : > { %843 = dma.hbm_to_vmem [thread:$0]  (!%p838_p10), %s145_s28, 6144, %s147_s5, [#allocation6], %s1249_s6, %s1249_s6, %s1066_s7  }
  0x14   : > { %s24_s9 = ssub.s32 %s1059_s15, %s1151_s8  ;;  %s27_s10 = sadd.s32 1, %s1055_s14 }
  0x15   : > { %p25_p12 = scmp.eq.s32.totalorder %s24_s9, 0  ;;  %p34_p13 = scmp.ne.s32.totalorder %s1055_s14, %s1051_s13 }
  0x16   : > { %p35_p0 = scmp.eq.s32.totalorder %s1059_s15, 0  ;;  %p854_p7 = scmp.lt.s32.totalorder %s1059_s15, 2 }
  0x17   : > { %s1160_s11 = scalar_select %p25_p12, %s1055_s14, %s27_s10  }
  0x18   : > { %p36_p3 = por %p35_p0, %p34_p13  ;;  %p1164_p5 = por %p106_p2, %p34_p13 }
  0x19   : > { %s160_s20 = sand.u32 1, %s1055_s14   ;;  %s691_s22 = sshll.u32 %s1059_s15, 2 }
  0x1a   : > { %s822_s21 = smul.u32 12, %s160_s20  ;;  %p1171_p9 = pnand %p854_p7, %p36_p3 }
  0x1b   : > { %s168_s27 = scalar_lea.hbm %s1245_s0, %s691_s22  ;;  %s161_s7 = scalar_lea.sflag [#allocation3], %s160_s20 }
  0x1c   : > { %s169_s28 = sshll.u32 %s168_s27, 4  ;;  %s164_s4 = scalar_lea.vmem [#allocation2], %s822_s21  ;;  %s170_s28 = int_to_ptr.hbm [resolvable:$true] %s169_s28 }
  0x1d   : > { %s171_s5 = sshll.u32 %s164_s4, 4  ;;  %s959_s9 = sshra.s32 %s170_s28, 4  ;;  %s172_s5 = int_to_ptr.vmem [resolvable:$true] %s171_s5  ;;  %s960_s9 = int_to_ptr.hbm [resolvable:$true] %s959_s9 }
  0x1e   : > { %s961_s10 = scalar_lea.hbm %s960_s9, 12  ;;  %p963_p10 = pneg %p1171_p9 }
  0x1f   : > { %p962_p2 = scmp.ne.s32.totalorder %s960_s9, %s961_s10  ;;  %s966_s25 = scalar_lea.hbm %s1245_s0, 24 }
  0x20   : > { %p967_p0 = scmp.lt.s32.totalorder %s960_s9, %s1245_s0  ;;  %p968_p3 = scmp.lt.s32.totalorder %s966_s25, %s961_s10 }
  0x21   : > { %p964_p12 = pnand %p963_p10, %p962_p2 }
  0x22   : > { %p969_p7 = por %p968_p3, %p967_p0 }
  0x23   : > { %p965_p13 = pneg %p964_p12 }
  0x25   : > { %p970_p11 = pnand %p969_p7, %p965_p13 }
  0x27   : > { %973 = shalt.err (!%p970_p11)
}
  0x28   : > { %s1256_s20 = smov 64   ;;  %s1257_s21 = smov 128  }
  0x29   : > { %847 = dma.hbm_to_vmem [thread:$0]  (!%p1171_p9), %s170_s28, 192, %s172_s5, %s161_s7, %s1257_s21, %s1256_s20, %s1063_s30  }
  0x2a   : > { %183 = sbr.rel (%p1133_p8) target bundleno = 355 (0x163), region = 32  ;;  %s1194_s29 = sand.u32 (!%p1133_p8), 1, %s1051_s13  }
  0x2b   : > { %s823_s6 = smul.u32 (!%p1133_p8), 12, %s1194_s29  ;;  %s186_s27 = scalar_lea.sflag (!%p1133_p8), [#allocation3], %s1194_s29 }
  0x2d   : > { %s1198_s4 = scalar_lea.vmem (!%p1133_p8), [#allocation2], %s823_s6 }
  0x2f   : > { %1034 = dma.done.wait (%p1120_p4), %s186_s27, 192  }
  0x30   : > { %1036 = vsyncadd (%p1120_p4), %s186_s27, 4294967104 }
  0x31   : > { %1038 = dma.done.wait (%p41_p1), [#allocation6], 9216  }
  0x32   : > { %1040 = vsyncadd (%p41_p1), [#allocation6], 4294958080  ;;  %v805_v0 = vld [vmem:[#allocation5 + $0x38] sm:$0xff]  ;;  %v804_v3 = vld [vmem:[#allocation5 + $0x30] sm:$0xff]  ;;  %s824_s18 = smul.u32 24, %s1194_s29  ;;  %s795_s23 = sshll.u32 %s1111_s16, 3 }
  0x33   : > { %v813_v1 = vld [vmem:[#allocation5 + $0x78] sm:$0xff]  ;;  %288 = vmatpush.bf16.msra.mxu3 %v805_v0  ;;  %v812_v4 = vld [vmem:[#allocation5 + $0x70] sm:$0xff]  ;;  %v803_v6 = vld [vmem:[#allocation5 + $0x28] sm:$0xff]  ;;  %s590_s28 = scalar_lea.hbm %s1248_s3, %s795_s23  ;;  %s580_s16 = scalar_lea.sflag [#allocation4], %s1194_s29 }
  0x34   : > { %v821_v2 = vld [vmem:[#allocation5 + $0xb8] sm:$0xff]  ;;  %406 = vmatpush.bf16.msra.mxu2 %v813_v1  ;;  %v820_v5 = vld [vmem:[#allocation5 + $0xb0] sm:$0xff]  ;;  %v811_v7 = vld [vmem:[#allocation5 + $0x68] sm:$0xff]  ;;  %s222_s5 = scalar_lea.vmem [#allocation8], %s824_s18  ;;  %s593_s9 = sshll.u32 %s590_s28, 4  ;;  %s594_s9 = int_to_ptr.hbm [resolvable:$true] %s593_s9 }
  0x35   : > { %526 = vmatpush.bf16.msra.mxu0 %v821_v2  ;;  %v819_v8 = vld [vmem:[#allocation5 + $0xa8] sm:$0xff]  ;;  %v316_v9 = vld [vmem:[#allocation7 + $0x78] sm:$0xff]  ;;  %v802_v10 = vld [vmem:[#allocation5 + $0x20] sm:$0xff]  ;;  %s591_s7 = sshll.u32 %s222_s5, 4  ;;  %s1003_s10 = sshra.s32 %s594_s9, 4  ;;  %s592_s7 = int_to_ptr.vmem [resolvable:$true] %s591_s7  ;;  %s1004_s10 = int_to_ptr.hbm [resolvable:$true] %s1003_s10 }
  0x36   : > { %v810_v11 = vld [vmem:[#allocation5 + $0x60] sm:$0xff]  ;;  %v315_v12 = vld [vmem:[#allocation7 + $0x70] sm:$0xff]  ;;  %317 = vmatpush.msra.mxu1 %v316_v9  ;;  %v314_v14 = vld [vmem:[#allocation7 + $0x68] sm:$0xff]  ;;  %s1005_s25 = scalar_lea.hbm %s1004_s10, 24  ;;  %s1009_s20 = scalar_lea.hbm %s1248_s3, 48 }
  0x37   : > { %289 = vmatpush.bf16.msra.mxu3 %v804_v3  ;;  %v818_v13 = vld [vmem:[#allocation5 + $0xa0] sm:$0xff]  ;;  %v801_v15 = vld [vmem:[#allocation5 + $0x18] sm:$0xff]  ;;  %v800_v20 = vld [vmem:[#allocation5 + $0x10] sm:$0xff]  ;;  %p1006_p1 = scmp.ne.s32.totalorder %s1004_s10, %s1005_s25  ;;  %p1010_p11 = scmp.lt.s32.totalorder %s1004_s10, %s1248_s3 }
  0x38   : > { %407 = vmatpush.bf16.msra.mxu2 %v812_v4  ;;  %318 = vmatpush.msra.mxu1 %v315_v12  ;;  %v809_v16 = vld [vmem:[#allocation5 + $0x58] sm:$0xff]  ;;  %v313_v17 = vld [vmem:[#allocation7 + $0x60] sm:$0xff]  ;;  %v808_v21 = vld [vmem:[#allocation5 + $0x50] sm:$0xff]  ;;  %p1011_p9 = scmp.lt.s32.totalorder %s1009_s20, %s1005_s25 }
  0x39   : > { %527 = vmatpush.bf16.msra.mxu0 %v820_v5  ;;  %v817_v18 = vld [vmem:[#allocation5 + $0x98] sm:$0xff]  ;;  %v311_v22 = vld [vmem:[#allocation7 + $0x50] sm:$0xff]  ;;  %v310_v24 = vld [vmem:[#allocation7 + $0x48] sm:$0xff]  ;;  %p1007_p4 = pnand %p1006_p1, %p1164_p5 }
  0x3a   : > { %319 = vmatpush.msra.mxu1 %v314_v14  ;;  %v312_v19 = vld [vmem:[#allocation7 + $0x58] sm:$0xff]  ;;  %v816_v23 = vld [vmem:[#allocation5 + $0x90] sm:$0xff]  ;;  %v799_v25 = vld [vmem:[#allocation5 + $0x8] sm:$0xff]  ;;  %p1012_p2 = por %p1011_p9, %p1010_p11 }
  0x3b   : > { %290 = vmatpush.bf16.msra.mxu3 %v803_v6  ;;  %v807_v26 = vld [vmem:[#allocation5 + $0x48] sm:$0xff]  ;;  %v309_v27 = vld [vmem:[#allocation7 + $0x40] sm:$0xff]  ;;  %v308_v29 = vld [vmem:[#allocation7 + $0x38] sm:$0xff]  ;;  %p1008_p8 = pneg %p1007_p4 }
  0x3c   : > { %408 = vmatpush.bf16.msra.mxu2 %v811_v7  ;;  %320 = vmatpush.msra.mxu1 %v313_v17  ;;  %v815_v28 = vld [vmem:[#allocation5 + $0x88] sm:$0xff]  ;;  %v798_v30 = vld [vmem:[#allocation5] sm:$0xff]  ;;  %v307_v32 = vld [vmem:[#allocation7 + $0x30] sm:$0xff] }
  0x3d   : > { %528 = vmatpush.bf16.msra.mxu0 %v819_v8  ;;  %v806_v31 = vld [vmem:[#allocation5 + $0x40] sm:$0xff]  ;;  %v306_v34 = vld [vmem:[#allocation7 + $0x28] sm:$0xff]  ;;  %v435_v35 = vld [vmem:[#allocation7 + $0xf8] sm:$0xff]  ;;  %p1013_p10 = pnand %p1012_p2, %p1008_p8 }
  0x3e   : > { %321 = vmatpush.msra.mxu1 %v312_v19  ;;  %v814_v33 = vld [vmem:[#allocation5 + $0x80] sm:$0xff]  ;;  %v223_v36 = vld [vmem:[%s1198_s4] sm:$0xf]  ;;  %v727_v37 = vld [vmem:[%s1198_s4 + $0x4] sm:$0xf] }
  0x3f   : > { %291 = vmatpush.bf16.msra.mxu3 %v802_v10  ;;  %v761_v38 = vld [vmem:[%s1198_s4 + $0x8] sm:$0xf]  ;;  %v305_v39 = vld [vmem:[#allocation7 + $0x20] sm:$0xff]  ;;  %v433_v42 = vld [vmem:[#allocation7 + $0xe8] sm:$0xff] }
  0x40   : > { %409 = vmatpush.bf16.msra.mxu2 %v810_v11  ;;  %322 = vmatpush.msra.mxu1 %v311_v22  ;;  %v434_v40 = vld [vmem:[#allocation7 + $0xf0] sm:$0xff]  ;;  %v304_v41 = vld [vmem:[#allocation7 + $0x18] sm:$0xff]  ;;  %v432_v44 = vld [vmem:[#allocation7 + $0xe0] sm:$0xff] }
  0x41   : > { %529 = vmatpush.bf16.msra.mxu0 %v818_v13  ;;  %v303_v43 = vld [vmem:[#allocation7 + $0x10] sm:$0xff]  ;;  %v302_v45 = vld [vmem:[#allocation7 + $0x8] sm:$0xff]  ;;  %v431_v46 = vld [vmem:[#allocation7 + $0xd8] sm:$0xff] }
  0x42   : > { %323 = vmatpush.msra.mxu1 %v310_v24  ;;  %v301_v47 = vld [vmem:[#allocation7] sm:$0xff]  ;;  %v555_v48 = vld [vmem:[#allocation7 + $0x178] sm:$0xff]  ;;  %v430_v49 = vld [vmem:[#allocation7 + $0xd0] sm:$0xff] }
  0x43   : > { %292 = vmatpush.bf16.msra.mxu3 %v801_v15  ;;  %v554_v50 = vld [vmem:[#allocation7 + $0x170] sm:$0xff]  ;;  %v429_v51 = vld [vmem:[#allocation7 + $0xc8] sm:$0xff]  ;;  %v428_v53 = vld [vmem:[#allocation7 + $0xc0] sm:$0xff] }
  0x44   : > { %410 = vmatpush.bf16.msra.mxu2 %v809_v16  ;;  %324 = vmatpush.msra.mxu1 %v309_v27  ;;  %v553_v52 = vld [vmem:[#allocation7 + $0x168] sm:$0xff]  ;;  %v552_v54 = vld [vmem:[#allocation7 + $0x160] sm:$0xff]  ;;  %v427_v55 = vld [vmem:[#allocation7 + $0xb8] sm:$0xff] }
  0x45   : > { %530 = vmatpush.bf16.msra.mxu0 %v817_v18  ;;  %v551_v56 = vld [vmem:[#allocation7 + $0x158] sm:$0xff]  ;;  %v426_v57 = vld [vmem:[#allocation7 + $0xb0] sm:$0xff]  ;;  %v425_v59 = vld [vmem:[#allocation7 + $0xa8] sm:$0xff] }
  0x46   : > { %325 = vmatpush.msra.mxu1 %v308_v29  ;;  %v550_v58 = vld [vmem:[#allocation7 + $0x150] sm:$0xff]  ;;  %v549_v60 = vld [vmem:[#allocation7 + $0x148] sm:$0xff]  ;;  %v424_v61 = vld [vmem:[#allocation7 + $0xa0] sm:$0xff] }
  0x47   : > { %293 = vmatpush.bf16.msra.mxu3 %v800_v20  ;;  %v548_v62 = vld [vmem:[#allocation7 + $0x140] sm:$0xff]  ;;  %v423_v63 = vld [vmem:[#allocation7 + $0x98] sm:$0xff]  ;;  %v422_v1 = vld [vmem:[#allocation7 + $0x90] sm:$0xff] }
  0x48   : > { %411 = vmatpush.bf16.msra.mxu2 %v808_v21  ;;  %326 = vmatpush.msra.mxu1 %v307_v32  ;;  %v547_v0 = vld [vmem:[#allocation7 + $0x138] sm:$0xff]  ;;  %v546_v2 = vld [vmem:[#allocation7 + $0x130] sm:$0xff]  ;;  %v545_v3 = vld [vmem:[#allocation7 + $0x128] sm:$0xff] }
  0x49   : > { %531 = vmatpush.bf16.msra.mxu0 %v816_v23  ;;  %v421_v4 = vld [vmem:[#allocation7 + $0x88] sm:$0xff]  ;;  %v544_v5 = vld [vmem:[#allocation7 + $0x120] sm:$0xff]  ;;  %v543_v7 = vld [vmem:[#allocation7 + $0x118] sm:$0xff] }
  0x4a   : > { %327 = vmatpush.msra.mxu1 %v306_v34  ;;  %v420_v6 = vld [vmem:[#allocation7 + $0x80] sm:$0xff]  ;;  %v542_v8 = vld [vmem:[#allocation7 + $0x110] sm:$0xff]  ;;  %v541_v9 = vld [vmem:[#allocation7 + $0x108] sm:$0xff] }
  0x4b   : > { %294 = vmatpush.bf16.msra.mxu3 %v799_v25  ;;  %v540_v10 = vld [vmem:[#allocation7 + $0x100] sm:$0xff] }
  0x4c   : > { %412 = vmatpush.bf16.msra.mxu2 %v807_v26  ;;  %328 = vmatpush.msra.mxu1 %v305_v39 }
  0x4d   : > { %532 = vmatpush.bf16.msra.mxu0 %v815_v28 }
  0x4e   : > { %329 = vmatpush.msra.mxu1 %v304_v41 }
  0x4f   : > { %295 = vmatpush.bf16.msra.mxu3 %v798_v30 }
  0x50   : > { %413 = vmatpush.bf16.msra.mxu2 %v806_v31  ;;  %330 = vmatpush.msra.mxu1 %v303_v43 }
  0x51   : > { %533 = vmatpush.bf16.msra.mxu0 %v814_v33 }
  0x52   : > { %296 = vmatmul.bf16.vlgmr.msra.gmra.mxu3 %v223_v36  ;;  %331 = vmatpush.msra.mxu1 %v302_v45 }
  0x53   : > { %436 = vmatpush.msrb.mxu3 %v435_v35  ;;  %414 = vmatmul.bf16.vlgmr.msra.gmra.mxu2 %v727_v37 }
  0x54   : > { %534 = vmatmul.bf16.vlgmr.msra.gmra.mxu0 %v761_v38  ;;  %332 = vmatpush.msra.mxu1 %v301_v47 }
  0x55   : > { %437 = vmatpush.msrb.mxu3 %v434_v40 }
  0x56   : > { %556 = vmatpush.msrb.mxu1 %v555_v48 }
  0x57   : > { %438 = vmatpush.msrb.mxu3 %v433_v42 }
  0x58   : > { %557 = vmatpush.msrb.mxu1 %v554_v50 }
  0x59   : > { %439 = vmatpush.msrb.mxu3 %v432_v44 }
  0x5a   : > { %558 = vmatpush.msrb.mxu1 %v553_v52 }
  0x5b   : > { %440 = vmatpush.msrb.mxu3 %v431_v46 }
  0x5c   : > { %559 = vmatpush.msrb.mxu1 %v552_v54 }
  0x5d   : > { %441 = vmatpush.msrb.mxu3 %v430_v49 }
  0x5e   : > { %560 = vmatpush.msrb.mxu1 %v551_v56 }
  0x5f   : > { %442 = vmatpush.msrb.mxu3 %v429_v51 }
  0x60   : > { %561 = vmatpush.msrb.mxu1 %v550_v58 }
  0x61   : > { %443 = vmatpush.msrb.mxu3 %v428_v53 }
  0x62   : > { %562 = vmatpush.msrb.mxu1 %v549_v60 }
  0x63   : > { %444 = vmatpush.msrb.mxu3 %v427_v55 }
  0x64   : > { %563 = vmatpush.msrb.mxu1 %v548_v62 }
  0x65   : > { %445 = vmatpush.msrb.mxu3 %v426_v57 }
  0x66   : > { %564 = vmatpush.msrb.mxu1 %v547_v0 }
  0x67   : > { %446 = vmatpush.msrb.mxu3 %v425_v59 }
  0x68   : > { %565 = vmatpush.msrb.mxu1 %v546_v2 }
  0x69   : > { %447 = vmatpush.msrb.mxu3 %v424_v61 }
  0x6a   : > { %566 = vmatpush.msrb.mxu1 %v545_v3 }
  0x6b   : > { %448 = vmatpush.msrb.mxu3 %v423_v63 }
  0x6c   : > { %567 = vmatpush.msrb.mxu1 %v544_v5 }
  0x6d   : > { %449 = vmatpush.msrb.mxu3 %v422_v1 }
  0x6e   : > { %568 = vmatpush.msrb.mxu1 %v543_v7 }
  0x6f   : > { %450 = vmatpush.msrb.mxu3 %v421_v4 }
  0x70   : > { %569 = vmatpush.msrb.mxu1 %v542_v8 }
  0x71   : > { %451 = vmatpush.msrb.mxu3 %v420_v6 }
  0x72   : > { %570 = vmatpush.msrb.mxu1 %v541_v9 }
  0x74   : > { %571 = vmatpush.msrb.mxu1 %v540_v10 }
  0xd1   : > { %v535_v11 = vpop.f32.mrf.mxu0 }
  0xd5   : > { %v297_v12 = vpop.f32.mrf.mxu3 }
  0xd6   : > { %v415_v13 = vpop.f32.mrf.mxu2  ;;  %333 = vmatmul.f32.vlgmr.msra.gmra.mxu1 %v297_v12 }
  0xd7   : > { %452 = vmatmul.f32.vlgmr.msrb.gmra.mxu3 %v415_v13 }
  0xd9   : > { %v537_v14 = vpop.f32.mrf.mxu0 }
  0xdd   : > { %v299_v15 = vpop.f32.mrf.mxu3 }
  0xde   : > { %v417_v16 = vpop.f32.mrf.mxu2  ;;  %572 = vmatmul.f32.vlgmr.msrb.gmra.mxu1 %v535_v11 }
 0x153   : > { %v334_v17 = vpop.f32.mrf.mxu1 }
 0x154   : > { %v337_v18 = vsub.f32 4.0, %v334_v17 }
 0x156   : > { %338 = vst [vmem:[%s222_s5] sm:$0xff] %v337_v18 }
 0x15a   : > { %v453_v19 = vpop.f32.mrf.mxu3 }
 0x15b   : > { %v456_v20 = vsub.f32 4.0, %v453_v19  ;;  %v573_v21 = vpop.f32.mrf.mxu1 }
 0x15c   : > { %v576_v22 = vsub.f32 4.0, %v573_v21 }
 0x15d   : > { %760 = vst [vmem:[%s222_s5 + $0x8] sm:$0xff] %v456_v20 }
 0x15e   : > { %794 = vst [vmem:[%s222_s5 + $0x10] sm:$0xff] %v576_v22 }
 0x15f   : > { %1016 = shalt.err (!%p1013_p10)
}
 0x160   : > { %s1067_s29 = smov 128   ;;  %s1068_s27 = smov 256  }
 0x161   : > { %s1069_s4 = smov 8  }
 0x162   : > { %835 = dma.vmem_to_hbm [thread:$0]  (%p1164_p5), %s592_s7, 384, %s594_s9, %s580_s16, %s1067_s29, %s1068_s27, %s1069_s4  }
 0x163 PF: > { %s608_s18 = sand.u32 1, %s1047_s12   ;;  %p1258_p12 = scmp.ge.s32.totalorder %s1059_s15, 2 }
 0x164   : > { %s609_s23 = scalar_lea.sflag [#allocation4], %s608_s18 }
 0x165   : > { %p849_p13 = pnand %p1258_p12, %p1125_p6 }
 0x167   : > { %p850_p0 = pneg %p849_p13 }
 0x169   : > { %1042 = dma.done.wait (%p850_p0), %s609_s23, 384  }
 0x16a   : > { %1044 = vsyncadd (%p850_p0), %s609_s23, 4294966912  ;;  %p17_p3 = scmp.ge.s32.totalorder %s1151_s8, 4   ;;  %s1259_s12 = smov %s1051_s13 }
 0x16b   : > { %s1260_s13 = smov %s1055_s14  ;;  %s1261_s14 = smov %s1160_s11 }
 0x16c   : > { %s1262_s15 = smov %s1151_s8  ;;  %19 = sbr.rel (!%p17_p3) target bundleno = 6 (0x6), region = 93 }
 0x171   :  { %615 = vsyncpa [#allocation3], 1 }
 0x172   :  { %617 = vsyncpa [#allocation3 + $0x1], 1 }
 0x173   :  { %618 = vsyncpa [#allocation6], 1 }
 0x174   :  { %619 = vsyncpa [#allocation4], 1 }
 0x175   :  { %621 = vsyncpa [#allocation4 + $0x1], 1 }

</bundles_post_ra>
